<compile_context>
chip_gen: v7x
topology: tpu7x:2x2x1
jax: 0.10.0
libtpu: 0.0.40
codegen_flags: <defaults>
</compile_context>

<pallas_src>
import functools
import math

import jax
import jax.numpy as jnp
from jax.experimental import pallas as pl
from jax.experimental.pallas import tpu as pltpu


def _round_up(n, m):
    return ((n + m - 1) // m) * m


def _detect_bf16_tanh() -> bool:
    """bf16 EUP/VPU exists on v6e / v7x; keep f32 tanh on v5e and older."""
    try:
        kind = jax.devices()[0].device_kind.lower()
    except Exception:
        return False
    return ("v6" in kind) or ("v7" in kind) or ("7x" in kind)


_BF16_TANH = _detect_bf16_tanh()


def _make_mlp_kernel(bf16_tanh: bool):
    def mlp_kernel(x_ref, w1_ref, b1_ref, w2_ref, b2_ref,
                   w3_ref, b3_ref, w4_ref, b4_ref, o_ref):
        x = x_ref[...]                                            # (tb, 2) f32

        def act(z_f32):
            # tanh -> bf16, ready for the next bf16-operand MXU dot.
            if bf16_tanh:
                return jnp.tanh(z_f32.astype(jnp.bfloat16))       # bf16 EUP
            return jnp.tanh(z_f32).astype(jnp.bfloat16)           # f32 EUP (v5e)

        # --- fc1 + tanh: K=2 is a degenerate contraction -> VPU (two
        # broadcast FMAs) instead of an MXU pass.
        z = (x[:, 0:1] * w1_ref[0:1, :]
             + x[:, 1:2] * w1_ref[1:2, :]
             + b1_ref[...])                                       # (tb, 128) f32
        h = act(z)

        # --- fc2 + tanh: bf16 operands, f32 accumulation on the MXU.
        z = jnp.dot(h, w2_ref[...],
                    preferred_element_type=jnp.float32) + b2_ref[...]
        h = act(z)

        # --- fc3 + tanh.
        z = jnp.dot(h, w3_ref[...],
                    preferred_element_type=jnp.float32) + b3_ref[...]
        h = act(z)

        # --- fc4 (128 -> 2): bf16 operands, f32 accumulation, no activation.
        out = jnp.dot(h, w4_ref[...],
                      preferred_element_type=jnp.float32) + b4_ref[...]
        o_ref[...] = out.astype(o_ref.dtype)

    return mlp_kernel


def prepare_params(params):
    """Pre-cast the three MXU-layer weights to bf16 ONCE (stored in params)."""
    p = dict(params)
    for name in ("w2", "w3", "w4"):
        p[name] = params[name].astype(jnp.bfloat16)
    return p


@functools.partial(jax.jit, static_argnames=("tb",))
def gradient_model_forward(x, params, *, tb=4096):
    """x: (B, 2) float32.

    params: dict from prepare_params() -- w1/b1..b4 float32, w2/w3/w4 bf16,
    all weights stored as (in_features, out_features).
    """
    B, Din = x.shape
    assert Din == 2

    # Batch tile: multiple of 8 sublanes; clamp so the grid has >= 2 steps
    # whenever the sublane-padded batch allows (keeps both v7x TCs busy).
    # VMEM scaling: ~2 KB of activations per batch row -> tb=4096 ~ 9 MB.
    tb = _round_up(max(tb, 8), 8)
    Bp8 = _round_up(B, 8)
    half = _round_up(pl.cdiv(Bp8, 2), 8)
    tb_eff = min(tb, half)

    Bp = _round_up(B, tb_eff)
    if Bp != B:
        x = jnp.pad(x, ((0, Bp - B), (0, 0)))

    w1, b1 = params["w1"], params["b1"]
    w2, b2 = params["w2"], params["b2"]
    w3, b3 = params["w3"], params["b3"]
    w4, b4 = params["w4"], params["b4"]
    Dout = w4.shape[1]

    # Weight / bias blocks are the full arrays, grid-invariant (no re-DMA).
    full = lambda shape: pl.BlockSpec(shape, lambda i: (0, 0))
    grid = (Bp // tb_eff,)

    out = pl.pallas_call(
        _make_mlp_kernel(_BF16_TANH),
        out_shape=jax.ShapeDtypeStruct((Bp, Dout), x.dtype),
        grid=grid,
        in_specs=[
            pl.BlockSpec((tb_eff, Din), lambda i: (i, 0)),   # x tile
            full(w1.shape), full(b1.shape),
            full(w2.shape), full(b2.shape),
            full(w3.shape), full(b3.shape),
            full(w4.shape), full(b4.shape),
        ],
        out_specs=pl.BlockSpec((tb_eff, Dout), lambda i: (i, 0)),
        compiler_params=pltpu.CompilerParams(
            # "parallel" lets the batch grid shard across v7x's 2 TensorCores.
            dimension_semantics=("parallel",),
            # Explicit scoped-VMEM limit: covers v5e's 16 MiB default when
            # tb is raised above ~4096; well under every chip's physical VMEM.
            vmem_limit_bytes=32 * 1024 * 1024,
        ),
    )(x, w1, b1, w2, b2, w3, b3, w4, b4)

    return out[:B] if Bp != B else out


def init_params(key):
    """Deterministic init matching PyTorch nn.Linear default:
    U(-1/sqrt(fan_in), 1/sqrt(fan_in)) for both weight and bias."""
    dims = [(2, 128), (128, 128), (128, 128), (128, 2)]
    params = {}
    for idx, (fan_in, fan_out) in enumerate(dims, start=1):
        key, kw, kb = jax.random.split(key, 3)
        bound = 1.0 / math.sqrt(fan_in)
        params[f"w{idx}"] = jax.random.uniform(
            kw, (fan_in, fan_out), jnp.float32, -bound, bound)
        params[f"b{idx}"] = jax.random.uniform(
            kb, (1, fan_out), jnp.float32, -bound, bound)
    return params


def reference_forward_f32(x, params):
    """Pure f32 reference == the PyTorch module's forward."""
    h = jnp.tanh(x @ params["w1"] + params["b1"])
    h = jnp.tanh(h @ params["w2"] + params["b2"])
    h = jnp.tanh(h @ params["w3"] + params["b3"])
    return h @ params["w4"] + params["b4"]


def reference_forward_bf16(x, params):
    """Reference mirroring the kernel's bf16 operand casts (tanh kept in f32;
    the kernel's optional bf16 tanh differs by ~1 bf16 ulp -> covered by tol)."""
    bf = lambda a: a.astype(jnp.bfloat16).astype(jnp.float32)
    w2, w3, w4 = bf(params["w2"]), bf(params["w3"]), bf(params["w4"])
    h = jnp.tanh(x @ params["w1"] + params["b1"])
    h = jnp.tanh(bf(h) @ w2 + params["b2"])
    h = jnp.tanh(bf(h) @ w3 + params["b3"])
    return bf(h) @ w4 + params["b4"]


if __name__ == "__main__":
    key = jax.random.PRNGKey(0)
    key, kx1, kx2 = jax.random.split(key, 3)
    params_f32 = init_params(key)
    params = prepare_params(params_f32)

    # Small batch: tile clamps so the grid still has 2 steps (v7x 2-TC split).
    B1 = 16
    x1 = jax.random.normal(kx1, (B1, 2), jnp.float32)
    out1 = jax.block_until_ready(gradient_model_forward(x1, params))
    assert out1.shape == (B1, 2)
    assert jnp.allclose(out1, reference_forward_bf16(x1, params_f32),
                        atol=2e-2, rtol=2e-2)
    assert jnp.allclose(out1, reference_forward_f32(x1, params_f32),
                        atol=5e-2, rtol=5e-2)

    # Ragged batch with a small explicit tile -> exercises padding + >2 steps.
    B2 = 300
    x2 = jax.random.normal(kx2, (B2, 2), jnp.float32)
    out2 = jax.block_until_ready(gradient_model_forward(x2, params, tb=64))
    assert out2.shape == (B2, 2)
    assert jnp.allclose(out2, reference_forward_bf16(x2, params_f32),
                        atol=2e-2, rtol=2e-2)
    assert jnp.allclose(out2, reference_forward_f32(x2, params_f32),
                        atol=5e-2, rtol=5e-2)

    print("KERNEL_OK")
</pallas_src>

<mosaic_0001>
module attributes {stable_mosaic.version = 11 : i64} {
  func.func @mlp_kernel(%arg0: i32, %arg1: memref<8x2xf32, #tpu.memory_space<vmem>>, %arg2: memref<2x128xf32, #tpu.memory_space<vmem>>, %arg3: memref<1x128xf32, #tpu.memory_space<vmem>>, %arg4: memref<128x128xbf16, #tpu.memory_space<vmem>>, %arg5: memref<1x128xf32, #tpu.memory_space<vmem>>, %arg6: memref<128x128xbf16, #tpu.memory_space<vmem>>, %arg7: memref<1x128xf32, #tpu.memory_space<vmem>>, %arg8: memref<128x2xbf16, #tpu.memory_space<vmem>>, %arg9: memref<1x2xf32, #tpu.memory_space<vmem>>, %arg10: memref<8x2xf32, #tpu.memory_space<vmem>>) attributes {dimension_semantics = [#tpu.dimension_semantics<parallel>], iteration_bounds = array<i64: 2>, scalar_prefetch = 0 : i64, scratch_operands = 0 : i64, tpu.core_type = #tpu.core_type<tc>, window_params = [{transform_indices = @transform_0, window_bounds = array<i64: 8, 2>}, {pipeline_mode = #tpu.pipeline_mode<synchronous>, transform_indices = @transform_1, window_bounds = array<i64: 2, 128>}, {pipeline_mode = #tpu.pipeline_mode<synchronous>, transform_indices = @transform_2, window_bounds = array<i64: 1, 128>}, {pipeline_mode = #tpu.pipeline_mode<synchronous>, transform_indices = @transform_3, window_bounds = array<i64: 128, 128>}, {pipeline_mode = #tpu.pipeline_mode<synchronous>, transform_indices = @transform_4, window_bounds = array<i64: 1, 128>}, {pipeline_mode = #tpu.pipeline_mode<synchronous>, transform_indices = @transform_5, window_bounds = array<i64: 128, 128>}, {pipeline_mode = #tpu.pipeline_mode<synchronous>, transform_indices = @transform_6, window_bounds = array<i64: 1, 128>}, {pipeline_mode = #tpu.pipeline_mode<synchronous>, transform_indices = @transform_7, window_bounds = array<i64: 128, 2>}, {pipeline_mode = #tpu.pipeline_mode<synchronous>, transform_indices = @transform_8, window_bounds = array<i64: 1, 2>}, {transform_indices = @transform_9, window_bounds = array<i64: 8, 2>}]} {
    %c0 = arith.constant 0 : index
    %c0_0 = arith.constant 0 : index
    %0 = vector.load %arg1[%c0, %c0_0] : memref<8x2xf32, #tpu.memory_space<vmem>>, vector<8x2xf32>
    %1 = vector.extract_strided_slice %0 {offsets = [0, 0], sizes = [8, 1], strides = [1, 1]} : vector<8x2xf32> to vector<8x1xf32>
    %c0_1 = arith.constant 0 : index
    %c0_2 = arith.constant 0 : index
    %2 = vector.load %arg2[%c0_1, %c0_2] : memref<2x128xf32, #tpu.memory_space<vmem>>, vector<1x128xf32>
    %3 = vector.broadcast %1 : vector<8x1xf32> to vector<8x128xf32>
    %4 = vector.broadcast %2 : vector<1x128xf32> to vector<8x128xf32>
    %5 = arith.mulf %3, %4 : vector<8x128xf32>
    %6 = vector.extract_strided_slice %0 {offsets = [0, 1], sizes = [8, 1], strides = [1, 1]} : vector<8x2xf32> to vector<8x1xf32>
    %c1 = arith.constant 1 : index
    %c0_3 = arith.constant 0 : index
    %7 = vector.load %arg2[%c1, %c0_3] : memref<2x128xf32, #tpu.memory_space<vmem>>, vector<1x128xf32>
    %8 = vector.broadcast %6 : vector<8x1xf32> to vector<8x128xf32>
    %9 = vector.broadcast %7 : vector<1x128xf32> to vector<8x128xf32>
    %10 = arith.mulf %8, %9 : vector<8x128xf32>
    %11 = arith.addf %5, %10 : vector<8x128xf32>
    %c0_4 = arith.constant 0 : index
    %c0_5 = arith.constant 0 : index
    %12 = vector.load %arg3[%c0_4, %c0_5] : memref<1x128xf32, #tpu.memory_space<vmem>>, vector<1x128xf32>
    %13 = vector.broadcast %12 : vector<1x128xf32> to vector<8x128xf32>
    %14 = arith.addf %11, %13 : vector<8x128xf32>
    %15 = math.tanh %14 : vector<8x128xf32>
    %16 = arith.truncf %15 : vector<8x128xf32> to vector<8x128xbf16>
    %c0_6 = arith.constant 0 : index
    %c0_7 = arith.constant 0 : index
    %17 = vector.load %arg4[%c0_6, %c0_7] : memref<128x128xbf16, #tpu.memory_space<vmem>>, vector<128x128xbf16>
    %cst = arith.constant dense<0.000000e+00> : vector<8x128xf32>
    %18 = tpu.matmul %16, %17, %cst {dimension_numbers = #tpu.dot_dimension_numbers<[1], [0], [0], [1], [0, 0, 1, 1], [], []>} : vector<8x128xbf16>, vector<128x128xbf16>, vector<8x128xf32> -> vector<8x128xf32>
    %c0_8 = arith.constant 0 : index
    %c0_9 = arith.constant 0 : index
    %19 = vector.load %arg5[%c0_8, %c0_9] : memref<1x128xf32, #tpu.memory_space<vmem>>, vector<1x128xf32>
    %20 = vector.broadcast %19 : vector<1x128xf32> to vector<8x128xf32>
    %21 = arith.addf %18, %20 : vector<8x128xf32>
    %22 = math.tanh %21 : vector<8x128xf32>
    %23 = arith.truncf %22 : vector<8x128xf32> to vector<8x128xbf16>
    %c0_10 = arith.constant 0 : index
    %c0_11 = arith.constant 0 : index
    %24 = vector.load %arg6[%c0_10, %c0_11] : memref<128x128xbf16, #tpu.memory_space<vmem>>, vector<128x128xbf16>
    %cst_12 = arith.constant dense<0.000000e+00> : vector<8x128xf32>
    %25 = tpu.matmul %23, %24, %cst_12 {dimension_numbers = #tpu.dot_dimension_numbers<[1], [0], [0], [1], [0, 0, 1, 1], [], []>} : vector<8x128xbf16>, vector<128x128xbf16>, vector<8x128xf32> -> vector<8x128xf32>
    %c0_13 = arith.constant 0 : index
    %c0_14 = arith.constant 0 : index
    %26 = vector.load %arg7[%c0_13, %c0_14] : memref<1x128xf32, #tpu.memory_space<vmem>>, vector<1x128xf32>
    %27 = vector.broadcast %26 : vector<1x128xf32> to vector<8x128xf32>
    %28 = arith.addf %25, %27 : vector<8x128xf32>
    %29 = math.tanh %28 : vector<8x128xf32>
    %30 = arith.truncf %29 : vector<8x128xf32> to vector<8x128xbf16>
    %c0_15 = arith.constant 0 : index
    %c0_16 = arith.constant 0 : index
    %31 = vector.load %arg8[%c0_15, %c0_16] : memref<128x2xbf16, #tpu.memory_space<vmem>>, vector<128x2xbf16>
    %cst_17 = arith.constant dense<0.000000e+00> : vector<8x2xf32>
    %32 = tpu.matmul %30, %31, %cst_17 {dimension_numbers = #tpu.dot_dimension_numbers<[1], [0], [0], [1], [0, 0, 1, 1], [], []>} : vector<8x128xbf16>, vector<128x2xbf16>, vector<8x2xf32> -> vector<8x2xf32>
    %c0_18 = arith.constant 0 : index
    %c0_19 = arith.constant 0 : index
    %33 = vector.load %arg9[%c0_18, %c0_19] : memref<1x2xf32, #tpu.memory_space<vmem>>, vector<1x2xf32>
    %34 = vector.broadcast %33 : vector<1x2xf32> to vector<8x2xf32>
    %35 = arith.addf %32, %34 : vector<8x2xf32>
    %c0_20 = arith.constant 0 : index
    %c0_21 = arith.constant 0 : index
    %36 = vector.load %arg10[%c0_20, %c0_21] : memref<8x2xf32, #tpu.memory_space<vmem>>, vector<8x2xf32>
    tpu.vector_store %arg10[%c0_20, %c0_21], %35 {strides = array<i32>} : memref<8x2xf32, #tpu.memory_space<vmem>>, vector<8x2xf32>,
    return
  }
  func.func @transform_0(%arg0: i32) -> (i32, i32) {
    %c0_i32 = arith.constant 0 : i32
    %c0_i32_0 = arith.constant 0 : i32
    return %arg0, %c0_i32 : i32, i32
  }
  func.func @transform_1(%arg0: i32) -> (i32, i32) {
    %c0_i32 = arith.constant 0 : i32
    %c0_i32_0 = arith.constant 0 : i32
    %c0_i32_1 = arith.constant 0 : i32
    return %c0_i32, %c0_i32_0 : i32, i32
  }
  func.func @transform_2(%arg0: i32) -> (i32, i32) {
    %c0_i32 = arith.constant 0 : i32
    %c0_i32_0 = arith.constant 0 : i32
    %c0_i32_1 = arith.constant 0 : i32
    return %c0_i32, %c0_i32_0 : i32, i32
  }
  func.func @transform_3(%arg0: i32) -> (i32, i32) {
    %c0_i32 = arith.constant 0 : i32
    %c0_i32_0 = arith.constant 0 : i32
    %c0_i32_1 = arith.constant 0 : i32
    return %c0_i32, %c0_i32_0 : i32, i32
  }
  func.func @transform_4(%arg0: i32) -> (i32, i32) {
    %c0_i32 = arith.constant 0 : i32
    %c0_i32_0 = arith.constant 0 : i32
    %c0_i32_1 = arith.constant 0 : i32
    return %c0_i32, %c0_i32_0 : i32, i32
  }
  func.func @transform_5(%arg0: i32) -> (i32, i32) {
    %c0_i32 = arith.constant 0 : i32
    %c0_i32_0 = arith.constant 0 : i32
    %c0_i32_1 = arith.constant 0 : i32
    return %c0_i32, %c0_i32_0 : i32, i32
  }
  func.func @transform_6(%arg0: i32) -> (i32, i32) {
    %c0_i32 = arith.constant 0 : i32
    %c0_i32_0 = arith.constant 0 : i32
    %c0_i32_1 = arith.constant 0 : i32
    return %c0_i32, %c0_i32_0 : i32, i32
  }
  func.func @transform_7(%arg0: i32) -> (i32, i32) {
    %c0_i32 = arith.constant 0 : i32
    %c0_i32_0 = arith.constant 0 : i32
    %c0_i32_1 = arith.constant 0 : i32
    return %c0_i32, %c0_i32_0 : i32, i32
  }
  func.func @transform_8(%arg0: i32) -> (i32, i32) {
    %c0_i32 = arith.constant 0 : i32
    %c0_i32_0 = arith.constant 0 : i32
    %c0_i32_1 = arith.constant 0 : i32
    return %c0_i32, %c0_i32_0 : i32, i32
  }
  func.func @transform_9(%arg0: i32) -> (i32, i32) {
    %c0_i32 = arith.constant 0 : i32
    %c0_i32_0 = arith.constant 0 : i32
    return %arg0, %c0_i32 : i32, i32
  }
}

</mosaic_0001>

<bundles_post_ra>
// kernel: gradient_model_forward.1
= control target key start
LH: loop header
LB: loop body
LE: loop exit
PB: predicated region body
PF: predicated region fallthrough
CT: control target
= control target key end

     0   :  { %14 = vsyncpa [#allocation3], 0  ;;  %s1063_s30 = smov 0   ;;  %s1222_s0 = inlined_call_operand.vmem [shape: f32[16,2], index: 0, kind: input, shape index: {}]   ;;  %s1223_s1 = inlined_call_operand.vmem [shape: f32[2,128], index: 1, kind: input, shape index: {}]   ;;  %s1224_s2 = inlined_call_operand.vmem [shape: f32[1,128], index: 2, kind: input, shape index: {}]   ;;  %s1225_s3 = inlined_call_operand.vmem [shape: bf16[128,128], index: 3, kind: input, shape index: {}]   ;;  %s1226_s4 = inlined_call_operand.vmem [shape: f32[1,128], index: 4, kind: input, shape index: {}]   ;;  %s1227_s5 = inlined_call_operand.hbm [shape: bf16[128,128], index: 5, kind: input, shape index: {}]   ;;  %s1228_s6 = inlined_call_operand.vmem [shape: f32[1,128], index: 6, kind: input, shape index: {}]   ;;  %s1229_s7 = inlined_call_operand.vmem [shape: bf16[128,2], index: 7, kind: input, shape index: {}]   ;;  %s1230_s8 = inlined_call_operand.vmem [shape: f32[1,2], index: 8, kind: input, shape index: {}]   ;;  %s1231_s9 = inlined_call_operand.vmem [shape: f32[16,2], index: 9, kind: output, shape index: {}]  }
   0x1 LB: > { %s1069_s10 = sadd.s32 4294967295, %s1004_s30   ;;  %p783_p0 = scmp.ge.s32.totalorder %s1004_s30, 1  ;;  %s1004_s30 = sphi %s1063_s30, %s20_s30  }
   0x2   : > { %p245_p1 = scmp.lt.s32.totalorder %s1004_s30, 3  ;;  %s1006_s11 = smov [#allocation2]  }
   0x3   : > { %s269_s12 = sshll.u32 %s1006_s11, 4  ;;  %p1232_p3 = scmp.eq.s32.totalorder %s1069_s10, 0  ;;  %s270_s12 = int_to_ptr.vmem [resolvable:$true] %s269_s12 }
   0x4   : > { %p1073_p2 = pnand %p783_p0, %p245_p1  ;;  %s966_s17 = scalar_lea.hbm %s1227_s5, 1024 }
   0x5   : > { %p967_p6 = scmp.ne.s32.totalorder %s1227_s5, %s966_s17  ;;  %p973_p10 = scmp.lt.u32.totalorder %s966_s17, %s1227_s5 }
   0x6   : > { %s1234_s13 = scalar_select %p1073_p2, 1, 0 }
   0x7   : > { %p913_p4 = pneg %p1073_p2 }
   0x9   : > { %p1082_p5 = pnand %p1232_p3, %p913_p4 }
   0xb   : > { %p968_p7 = pneg %p1082_p5 }
   0xd   : > { %p969_p8 = pnand %p968_p7, %p967_p6 }
   0xf   : > { %p970_p9 = pneg %p969_p8 }
  0x11   : > { %p975_p11 = pnand %p973_p10, %p970_p9 }
  0x13   : > { %978 = shalt.err (!%p975_p11)
}
  0x14   : > { %s979_s22 = scalar_lea.vmem %s270_s12, 1024  ;;  %p987_p1 = scmp.lt.s32.totalorder %s270_s12, %s270_s12 }
  0x15   : > { %p980_p12 = scmp.ne.s32.totalorder %s270_s12, %s979_s22  ;;  %p988_p4 = scmp.lt.s32.totalorder %s979_s22, %s979_s22 }
  0x17   : > { %p982_p13 = pnand %p980_p12, %p968_p7  ;;  %p989_p3 = por %p988_p4, %p987_p1 }
  0x19   : > { %p983_p0 = pneg %p982_p13 }
  0x1b   : > { %p990_p2 = pnand %p989_p3, %p983_p0 }
  0x1d   : > { %993 = shalt.err (!%p990_p2)
}
  0x1e   : > { %s1007_s23 = smov 64   ;;  %s1008_s24 = smov 4  }
  0x1f   : > { %916 = dma.hbm_to_vmem [thread:$0]  (!%p1082_p5), %s1227_s5, 1024, %s270_s12, [#allocation3], %s1007_s23, %s1007_s23, %s1008_s24  }
  0x20   : > { %p1236_p6 = scmp.ne.s32.totalorder %s1234_s13, 0 }
  0x21   : > { %p1237_p8 = scmp.eq.s32.totalorder (!%p1236_p6), %s1069_s10, 0 }
  0x22   : > { %301 = sbr.rel (%p1236_p6) target bundleno = 869 (0x365), region = 56 }
  0x29   : > { %999 = dma.done.wait (%p1237_p8), [#allocation3], 1024   ;;  %p1238_p7 = pmov %p1237_p8 }
  0x2a   : > { %p335_p2 = scmp.lt.s32.totalorder %s1069_s10, 1  ;;  %v1009_v0 = vmov 0   ;;  %v1010_v1 = vmov 0.0   ;;  %v936_v3 = vld [vmem:[%s1225_s3] sm:$0xff]   ;;  %v937_v4 = vld [vmem:[%s1225_s3 + $0x8] sm:$0xff]   ;;  %v1011_v5 = vmov 1  }
  0x2b   : > { %1001 = vsyncadd (%p1238_p7), [#allocation3], 4294966272  ;;  %934 = vset.pattern.permute.xlu0 %v1009_v0  ;;  %849 = vmatprep.subr.bf16.mxu0 %v1010_v1  ;;  %v938_v6 = vld [vmem:[%s1225_s3 + $0x10] sm:$0xff]   ;;  %v939_v7 = vld [vmem:[%s1225_s3 + $0x18] sm:$0xff]   ;;  %vm1012_vm0 = vmmov 0   ;;  %vm714_vm1 = vcmask 15360  }
  0x2c   : > { %s1240_s10 = smov (!%p335_p2, %s1069_s10), 1  ;;  %869 = vmatprep.subr.bf16.mxu1 %v1010_v1  ;;  %850 = vmatpush3.bf16.msra.mxu0 %v936_v3  ;;  %v940_v8 = vld [vmem:[%s1225_s3 + $0x20] sm:$0xff]   ;;  %v941_v9 = vld [vmem:[%s1225_s3 + $0x28] sm:$0xff]   ;;  %v942_v10 = vld [vmem:[%s1225_s3 + $0x30] sm:$0xff]  }
  0x2d   : > { %s788_s27 = sshll.u32 %s1240_s10, 3  ;;  %851 = vmatprep.subr.bf16.mxu0 %v1010_v1  ;;  %865 = vmatprep.mubr.msk.bf16.mxu0 %vm1012_vm0, %v1010_v1  ;;  %v944_v11 = vld [vmem:[#allocation2] sm:$0xff]   ;;  %v943_v12 = vld [vmem:[%s1225_s3 + $0x38] sm:$0xff]   ;;  %v945_v13 = vld [vmem:[#allocation2 + $0x8] sm:$0xff]  }
  0x2e   : > { %s338_s11 = scalar_lea.vmem %s1222_s0, %s788_s27  ;;  %885 = vmatprep.mubr.msk.bf16.mxu1 %vm1012_vm0, %v1010_v1  ;;  %870 = vmatpush3.bf16.msra.mxu1 %v944_v11  ;;  %v946_v14 = vld [vmem:[#allocation2 + $0x10] sm:$0xff]   ;;  %v947_v15 = vld [vmem:[#allocation2 + $0x18] sm:$0xff]   ;;  %v790_v17 = vld [vmem:[%s1223_s1] ss:$0 sm:$0xff]  ;;  %s342_s22 = scalar_lea.vmem %s1231_s9, %s788_s27 }
  0x2f   : > { %v344_v2 = vld [vmem:[%s338_s11] sm:$0xff]  ;;  %871 = vmatprep.subr.bf16.mxu1 %v1010_v1  ;;  %v949_v28 = vld [vmem:[#allocation2 + $0x28] sm:$0xff]   ;;  %v950_v29 = vld [vmem:[#allocation2 + $0x30] sm:$0xff]  }
  0x30   : > { %348 = vperm.xlu0 %934, %v344_v2   ;;  %852 = vmatpush3.bf16.msra.mxu0 %v937_v4  ;;  %v791_v18 = vld [vmem:[%s1223_s1 + $0x1] ss:$0 sm:$0xff]  ;;  %v792_v22 = vld [vmem:[%s1224_s2] ss:$0 sm:$0xff]  ;;  %v951_v30 = vld [vmem:[#allocation2 + $0x38] sm:$0xff]  }
  0x31   : > { %853 = vmatprep.subr.bf16.mxu0 %v1010_v1  ;;  %v948_v27 = vld [vmem:[#allocation2 + $0x20] sm:$0xff]   ;;  %v953_v32 = vld [vmem:[%s1229_s7 + $0x8] sm:$0xff]   ;;  %v954_v33 = vld [vmem:[%s1229_s7 + $0x10] sm:$0xff]  }
  0x32   : > { %872 = vmatpush3.bf16.msra.mxu1 %v945_v13  ;;  %v952_v31 = vld [vmem:[%s1229_s7] sm:$0xff]   ;;  %v955_v34 = vld [vmem:[%s1229_s7 + $0x18] sm:$0xff]   ;;  %v957_v44 = vld [vmem:[%s1229_s7 + $0x28] sm:$0xff]  }
  0x33   : > { %873 = vmatprep.subr.bf16.mxu1 %v1010_v1  ;;  %v793_v35 = vld [vmem:[%s1226_s4] ss:$0 sm:$0xff]  ;;  %v958_v45 = vld [vmem:[%s1229_s7 + $0x30] sm:$0xff]   ;;  %v959_v46 = vld [vmem:[%s1229_s7 + $0x38] sm:$0xff]  }
  0x34   : > { %935 = vset.pattern.permute.xlu0 %v1011_v5  ;;  %854 = vmatpush3.bf16.msra.mxu0 %v938_v6  ;;  %v956_v43 = vld [vmem:[%s1229_s7 + $0x20] sm:$0xff]  }
  0x35   : > { %358 = vperm.xlu0 %935, %v344_v2   ;;  %855 = vmatprep.subr.bf16.mxu0 %v1010_v1  ;;  %v802_v47 = vld [vmem:[%s1228_s6] ss:$0 sm:$0xff] }
  0x36   : > { %874 = vmatpush3.bf16.msra.mxu1 %v946_v14  ;;  %v811_v55 = vld [vmem:[%s1230_s8] ss:$0 sm:$0xff] }
  0x37   : > { %875 = vmatprep.subr.bf16.mxu1 %v1010_v1 }
  0x38   : > { %856 = vmatpush3.bf16.msra.mxu0 %v939_v7 }
  0x39   : > { %857 = vmatprep.subr.bf16.mxu0 %v1010_v1 }
  0x3a   : > { %876 = vmatpush3.bf16.msra.mxu1 %v947_v15 }
  0x3b   : > { %877 = vmatprep.subr.bf16.mxu1 %v1010_v1 }
  0x3c   : > { %858 = vmatpush3.bf16.msra.mxu0 %v940_v8 }
  0x3d   : > { %859 = vmatprep.subr.bf16.mxu0 %v1010_v1 }
  0x3e   : > { %878 = vmatpush3.bf16.msra.mxu1 %v948_v27 }
  0x3f   : > { %879 = vmatprep.subr.bf16.mxu1 %v1010_v1 }
  0x40   : > { %860 = vmatpush3.bf16.msra.mxu0 %v941_v9 }
  0x41   : > { %861 = vmatprep.subr.bf16.mxu0 %v1010_v1 }
  0x42   : > { %880 = vmatpush3.bf16.msra.mxu1 %v949_v28 }
  0x43   : > { %881 = vmatprep.subr.bf16.mxu1 %v1010_v1 }
  0x44   : > { %862 = vmatpush3.bf16.msra.mxu0 %v942_v10 }
  0x45   : > { %863 = vmatprep.subr.bf16.mxu0 %v1010_v1 }
  0x46   : > { %882 = vmatpush3.bf16.msra.mxu1 %v950_v29 }
  0x47   : > { %883 = vmatprep.subr.bf16.mxu1 %v1010_v1 }
  0x48   : > { %864 = vmatpush3.bf16.msra.mxu0 %v943_v12 }
  0x49   : > { %889 = vmatprep.subr.bf16.mxu0 %v1010_v1 }
  0x4a   : > { %884 = vmatpush3.bf16.msra.mxu1 %v951_v30 }
  0xaf   : > { %v349_v16 = vpop.permute.xlu0 %348 }
  0xb0   : > { %v355_v20 = vmul.f32 %v790_v17, %v349_v16 }
  0xb4   : > { %v359_v19 = vpop.permute.xlu0 %358 }
  0xb5   : > { %v365_v21 = vmul.f32 %v791_v18, %v359_v19 }
  0xb7   : > { %v366_v23 = vadd.f32 %v365_v21, %v355_v20 }
  0xb9   : > { %v374_v24 = vadd.f32 %v792_v22, %v366_v23 }
  0xbb   : > { %960 = vtanh.f32 %v374_v24 }
  0xc5   : > { %v961_v25 = vpop.eup %960 }
  0xc6   : > { %v376_v26 = vpack.c.bf16 %v961_v25, %v961_v25 }
  0xc8   : > { %866 = vmatmul.mubr.bf16.vlgmr.msra.gmra.mrb[0].mxu0 %v376_v26 }
  0xc9   : > { %905 = vmatprep.mubr.msk.bf16.mxu0 %vm1012_vm0, %v1010_v1  ;;  %890 = vmatpush3.bf16.msra.mxu0 %v952_v31 }
  0xca   : > { %891 = vmatprep.subr.bf16.mxu0 %v1010_v1 }
  0xcd   : > { %892 = vmatpush3.bf16.msra.mxu0 %v953_v32 }
  0xce   : > { %893 = vmatprep.subr.bf16.mxu0 %v1010_v1 }
  0xd1   : > { %894 = vmatpush3.bf16.msra.mxu0 %v954_v33 }
  0xd2   : > { %895 = vmatprep.subr.bf16.mxu0 %v1010_v1 }
  0xd5   : > { %896 = vmatpush3.bf16.msra.mxu0 %v955_v34 }
  0xd6   : > { %897 = vmatprep.subr.bf16.mxu0 %v1010_v1 }
  0xd9   : > { %898 = vmatpush3.bf16.msra.mxu0 %v956_v43 }
  0xda   : > { %899 = vmatprep.subr.bf16.mxu0 %v1010_v1 }
  0xdd   : > { %900 = vmatpush3.bf16.msra.mxu0 %v957_v44 }
  0xde   : > { %901 = vmatprep.subr.bf16.mxu0 %v1010_v1 }
  0xe1   : > { %902 = vmatpush3.bf16.msra.mxu0 %v958_v45 }
  0xe2   : > { %903 = vmatprep.subr.bf16.mxu0 %v1010_v1 }
  0xe5   : > { %904 = vmatpush3.bf16.msra.mxu0 %v959_v46 }
 0x19b   : > { %v482_v36 = vpop.f32.mrb[0].mxu0 }
 0x19c   : > { %v483_v37 = vadd.f32 %v793_v35, %v482_v36  ;;  %v867_v38 = vpop.f32.mrb[1].mxu0 }
 0x19d   : > { %v485_v39 = vpop.f32.mrb[2].mxu0 }
 0x19e   : > { %962 = vtanh.f32 %v483_v37  ;;  %v868_v40 = vpop.f32.mrb[3].mxu0 }
 0x1a8   : > { %v963_v41 = vpop.eup %962 }
 0x1a9   : > { %v489_v42 = vpack.c.bf16 %v963_v41, %v963_v41 }
 0x1ab   : > { %886 = vmatmul.mubr.bf16.vlgmr.msra.gmra.mrb[0].mxu1 %v489_v42 }
 0x27e   : > { %v595_v48 = vpop.f32.mrb[0].mxu1 }
 0x27f   : > { %v596_v49 = vadd.f32 %v802_v47, %v595_v48  ;;  %v887_v50 = vpop.f32.mrb[1].mxu1 }
 0x280   : > { %v598_v51 = vpop.f32.mrb[2].mxu1 }
 0x281   : > { %964 = vtanh.f32 %v596_v49  ;;  %v888_v52 = vpop.f32.mrb[3].mxu1 }
 0x28b   : > { %v965_v53 = vpop.eup %964 }
 0x28c   : > { %v602_v54 = vpack.c.bf16 %v965_v53, %v965_v53 }
 0x28e   : > { %906 = vmatmul.mubr.bf16.vlgmr.msra.gmra.mrb[4].mxu0 %v602_v54 }
 0x361   : > { %v708_v56 = vpop.f32.mrb[4].mxu0 }
 0x362   : > { %v709_v57 = vadd.f32 %v811_v55, %v708_v56  ;;  %v907_v58 = vpop.f32.mrb[5].mxu0 }
 0x363   : > { %v711_v59 = vpop.f32.mrb[6].mxu0 }
 0x364   : > { %715 = vst.msk [vmem:[%s342_s22] sm:$0xff] %vm714_vm1, %v709_v57  ;;  %v908_v60 = vpop.f32.mrb[7].mxu0 }
 0x365 PF: > { %s20_s30 = sadd.s32 1, %s1004_s30  }
 0x366   : > { %p17_p3 = scmp.ge.s32.totalorder %s20_s30, 4  }
 0x368   :  { %19 = sbr.rel (!%p17_p3) target bundleno = 1 (0x1), region = 91 }
 0x36f   :  { %735 = vsyncpa [#allocation3], 1 }
 0x370   :  { %737 = vsyncpa [#allocation3 + $0x1], 1 }

</bundles_post_ra>
